<compile_context>
chip_gen: v7x
topology: tpu7x:2x2x1
jax: 0.10.0
libtpu: 0.0.40
codegen_flags: <defaults>
</compile_context>

<pallas_src>
import functools

import jax
import jax.numpy as jnp
from jax.experimental import pallas as pl
from jax.experimental.pallas import tpu as pltpu

LOG_STD_MAX = 2.0
LOG_STD_MIN = -20.0


def _round_up(x, m):
    return ((x + m - 1) // m) * m


def _sublane(dtype):
    # Packed sublane tile rows: 8 for 4-byte, 16 for 2-byte, 32 for 1-byte dtypes.
    return 8 * (4 // jnp.dtype(dtype).itemsize)


def _policy_kernel(
    x_ref,      # (TB, S_p)   streamed activations tile (compute dtype)
    w1_ref,     # (S_p, H_p)  resident
    b1_ref,     # (1,  H_p)   resident, f32
    w2_ref,     # (H_p, H_p)  resident
    b2_ref,     # (1,  H_p)   resident, f32
    wh_ref,     # (H_p, A2_p) resident fused [mean | log_std] head
    bh_ref,     # (1,  A2_p)  resident, f32
    lo_ref,     # (1,  A2_p)  resident clamp lower bound (f32)
    hi_ref,     # (1,  A2_p)  resident clamp upper bound (f32)
    out_ref,    # (TB, A2_p)  fused lane-dense output tile (f32)
):
    x = x_ref[...]

    # Layer 1: Linear + ReLU (MXU matmul with f32 accumulation; elementwise f32).
    h1 = jnp.dot(x, w1_ref[...], preferred_element_type=jnp.float32) + b1_ref[...]
    h1 = jnp.maximum(h1, 0.0).astype(w2_ref.dtype)

    # Layer 2: Linear + ReLU.
    h2 = jnp.dot(h1, w2_ref[...], preferred_element_type=jnp.float32) + b2_ref[...]
    h2 = jnp.maximum(h2, 0.0).astype(wh_ref.dtype)

    # Fused heads: one lane-dense matmul; mean in cols [0, A), log_std in [A, 2A).
    heads = jnp.dot(h2, wh_ref[...], preferred_element_type=jnp.float32) + bh_ref[...]

    # Clamp with resident bounds: lo/hi are (-inf, +inf) on mean columns and the
    # zero padded tail (>= 2A, sliced off in the wrapper), (LOG_STD_MIN,
    # LOG_STD_MAX) on the log_std columns.
    heads = jnp.minimum(jnp.maximum(heads, lo_ref[...]), hi_ref[...])
    out_ref[...] = heads.astype(out_ref.dtype)


def _const_spec(shape):
    """Resident (fetched-once) block: constant index_map, single-buffered."""
    index_map = lambda i: (0, 0)
    try:
        return pl.BlockSpec(shape, index_map,
                            pipeline_mode=pl.Buffered(buffer_count=1))
    except (AttributeError, TypeError):
        # Older JAX without pipeline_mode / Buffered: fall back to default
        # pipelining (still only fetched once thanks to the constant index_map).
        return pl.BlockSpec(shape, index_map)


def prepare_params(params, compute_dtype=jnp.bfloat16):
    """One-time weight prep: fuse heads, pad to lane/sublane tiles, cast.

    Run once (e.g. after each optimizer step) and reuse the result for every
    forward call -- all weight-side HBM traffic is hoisted here.
    """
    w1, b1, w2, b2 = params["w1"], params["b1"], params["w2"], params["b2"]
    wm, bm, ws, bs = params["wm"], params["bm"], params["ws"], params["bs"]

    S, H = w1.shape
    A = wm.shape[1]
    sub = _sublane(compute_dtype)
    S_p = _round_up(S, sub)          # sublane dim of w1 / full-extent lane dim of x
    H_p = _round_up(H, 128)          # lane-dense hidden width
    A2_p = _round_up(2 * A, 128)     # lane-dense fused head width

    # Fuse mean + log_std heads into a single (H, 2A) matmul.
    wh = jnp.concatenate([wm, ws], axis=1)
    bh = jnp.concatenate([bm, bs], axis=1)

    def pad2(a, r, c):
        return jnp.pad(a, ((0, r - a.shape[0]), (0, c - a.shape[1])))

    # MXU inputs in compute_dtype; biases stay f32 (added to the f32 accumulator;
    # keeps the VPU path f32, which v5e requires).
    prepped = dict(
        w1=pad2(w1, S_p, H_p).astype(compute_dtype),
        b1=pad2(b1, 1, H_p).astype(jnp.float32),
        w2=pad2(w2, H_p, H_p).astype(compute_dtype),
        b2=pad2(b2, 1, H_p).astype(jnp.float32),
        wh=pad2(wh, H_p, A2_p).astype(compute_dtype),
        bh=pad2(bh, 1, A2_p).astype(jnp.float32),
    )

    # Resident clamp bounds (only log_std columns [A, 2A) are clamped).
    col = jnp.arange(A2_p)
    is_log_std = (col >= A) & (col < 2 * A)
    prepped["lo"] = jnp.where(is_log_std, LOG_STD_MIN, -jnp.inf)[None, :].astype(jnp.float32)
    prepped["hi"] = jnp.where(is_log_std, LOG_STD_MAX, jnp.inf)[None, :].astype(jnp.float32)
    return prepped


@functools.partial(jax.jit, static_argnames=("action_dim", "block_b"))
def squashed_gaussian_policy_forward(state, prepped, *, action_dim, block_b=512):
    """Pallas forward pass.  `prepped` comes from prepare_params().

    Returns (mean, log_std), both (B, action_dim) float32.
    """
    B, S = state.shape
    cdt = prepped["w1"].dtype
    S_p, H_p = prepped["w1"].shape
    A2_p = prepped["wh"].shape[1]
    A = action_dim

    # Batch tile: balanced over grid steps for ragged B, aligned to the packed
    # sublane tile of the compute dtype, capped at block_b.
    sub = _sublane(cdt)
    n_tiles = max(1, -(-B // max(block_b, 1)))
    TB = _round_up(-(-B // n_tiles), sub)
    TB = min(TB, _round_up(block_b, sub))
    B_p = _round_up(B, TB)

    x_p = jnp.pad(state, ((0, B_p - B), (0, S_p - S))).astype(cdt)

    grid = (B_p // TB,)
    row = lambda i: (i, 0)     # batch-tiled activations / output

    itemsize = jnp.dtype(cdt).itemsize
    weight_bytes = (prepped["w1"].size + prepped["w2"].size + prepped["wh"].size) * itemsize
    bias_bytes = (prepped["b1"].size + prepped["b2"].size + prepped["bh"].size
                  + prepped["lo"].size + prepped["hi"].size) * 4
    tile_bytes = 2 * (TB * S_p * itemsize + TB * A2_p * 4)   # double-buffered x / out tiles
    interm_bytes = 4 * TB * H_p * 4                          # h1/h2 f32 live values + slack
    # Generous limit (covers double-buffered weights if pipeline_mode is
    # unsupported), capped safely below v5e/v6e physical VMEM.
    vmem_limit = min(2 * weight_bytes + bias_bytes + tile_bytes + interm_bytes + (4 << 20),
                     96 << 20)
    vmem_limit = max(vmem_limit, 16 << 20)

    cost = pl.CostEstimate(
        flops=2 * B_p * (S_p * H_p + H_p * H_p + H_p * A2_p),
        transcendentals=0,
        bytes_accessed=(weight_bytes + bias_bytes
                        + B_p * S_p * itemsize + B_p * A2_p * 4),
    )

    out = pl.pallas_call(
        _policy_kernel,
        out_shape=jax.ShapeDtypeStruct((B_p, A2_p), jnp.float32),
        grid=grid,
        in_specs=[
            pl.BlockSpec((TB, S_p), row),     # streamed activations
            _const_spec((S_p, H_p)),          # w1 (resident)
            _const_spec((1, H_p)),            # b1
            _const_spec((H_p, H_p)),          # w2
            _const_spec((1, H_p)),            # b2
            _const_spec((H_p, A2_p)),         # fused head weights
            _const_spec((1, A2_p)),           # fused head bias
            _const_spec((1, A2_p)),           # clamp lo
            _const_spec((1, A2_p)),           # clamp hi
        ],
        out_specs=pl.BlockSpec((TB, A2_p), row),
        compiler_params=pltpu.CompilerParams(
            dimension_semantics=("parallel",),
            vmem_limit_bytes=int(vmem_limit),
        ),
        cost_estimate=cost,
    )(x_p, prepped["w1"], prepped["b1"], prepped["w2"], prepped["b2"],
      prepped["wh"], prepped["bh"], prepped["lo"], prepped["hi"])

    mean = out[:B, :A]
    log_std = out[:B, A:2 * A]
    return mean, log_std


def init_params(key, state_dim, action_dim, hidden_dim):
    """Deterministic synthetic parameters (shapes match the nn.Linear layers)."""
    ks = jax.random.split(key, 8)

    def linear(kw, kb, fan_in, fan_out):
        bound = 1.0 / jnp.sqrt(fan_in)
        w = jax.random.uniform(kw, (fan_in, fan_out), jnp.float32, -bound, bound)
        b = jax.random.uniform(kb, (1, fan_out), jnp.float32, -bound, bound)
        return w, b

    w1, b1 = linear(ks[0], ks[1], state_dim, hidden_dim)
    w2, b2 = linear(ks[2], ks[3], hidden_dim, hidden_dim)
    wm, bm = linear(ks[4], ks[5], hidden_dim, action_dim)
    ws, bs = linear(ks[6], ks[7], hidden_dim, action_dim)
    return dict(w1=w1, b1=b1, w2=w2, b2=b2, wm=wm, bm=bm, ws=ws, bs=bs)


def reference_forward(state, params):
    """Pure-JAX reference matching the PyTorch module semantics."""
    h = jnp.maximum(state @ params["w1"] + params["b1"], 0.0)
    h = jnp.maximum(h @ params["w2"] + params["b2"], 0.0)
    mean = h @ params["wm"] + params["bm"]
    log_std = jnp.clip(h @ params["ws"] + params["bs"], LOG_STD_MIN, LOG_STD_MAX)
    return mean, log_std


if __name__ == "__main__":
    key = jax.random.PRNGKey(0)
    k_param, k_state, k_state2 = jax.random.split(key, 3)

    batch, state_dim, action_dim, hidden_dim = 8, 16, 8, 32
    params = init_params(k_param, state_dim, action_dim, hidden_dim)
    state = jax.random.normal(k_state, (batch, state_dim), jnp.float32)
    ref_mean, ref_log_std = reference_forward(state, params)

    # --- f32 compute path: tight check against the reference -----------------
    prepped_f32 = prepare_params(params, compute_dtype=jnp.float32)
    mean, log_std = squashed_gaussian_policy_forward(
        state, prepped_f32, action_dim=action_dim)
    jax.block_until_ready((mean, log_std))
    assert mean.shape == (batch, action_dim) and log_std.shape == (batch, action_dim)
    assert jnp.allclose(mean, ref_mean, atol=1e-5, rtol=1e-5)
    assert jnp.allclose(log_std, ref_log_std, atol=1e-5, rtol=1e-5)
    assert bool(jnp.all(log_std <= LOG_STD_MAX)) and bool(jnp.all(log_std >= LOG_STD_MIN))

    # --- default bf16 MXU path: dtype-aware tolerance -------------------------
    prepped_bf16 = prepare_params(params)  # compute_dtype defaults to bfloat16
    mean16, log_std16 = squashed_gaussian_policy_forward(
        state, prepped_bf16, action_dim=action_dim)
    jax.block_until_ready((mean16, log_std16))
    assert jnp.allclose(mean16, ref_mean, atol=5e-2, rtol=5e-2)
    assert jnp.allclose(log_std16, ref_log_std, atol=5e-2, rtol=5e-2)
    assert bool(jnp.all(log_std16 <= LOG_STD_MAX)) and bool(jnp.all(log_std16 >= LOG_STD_MIN))

    # --- multi-tile grid + ragged batch (balanced TB) --------------------------
    batch2 = 20
    state2 = jax.random.normal(k_state2, (batch2, state_dim), jnp.float32)
    mean2, log_std2 = squashed_gaussian_policy_forward(
        state2, prepped_f32, action_dim=action_dim, block_b=8)
    jax.block_until_ready((mean2, log_std2))
    ref_mean2, ref_log_std2 = reference_forward(state2, params)
    assert mean2.shape == (batch2, action_dim)
    assert jnp.allclose(mean2, ref_mean2, atol=1e-5, rtol=1e-5)
    assert jnp.allclose(log_std2, ref_log_std2, atol=1e-5, rtol=1e-5)

    print("KERNEL_OK")
</pallas_src>

<mosaic_0001>
module attributes {stable_mosaic.version = 11 : i64} {
  func.func @_policy_kernel(%arg0: i32, %arg1: memref<8x16xf32, #tpu.memory_space<vmem>>, %arg2: memref<16x128xf32, #tpu.memory_space<vmem>>, %arg3: memref<1x128xf32, #tpu.memory_space<vmem>>, %arg4: memref<128x128xf32, #tpu.memory_space<vmem>>, %arg5: memref<1x128xf32, #tpu.memory_space<vmem>>, %arg6: memref<128x128xf32, #tpu.memory_space<vmem>>, %arg7: memref<1x128xf32, #tpu.memory_space<vmem>>, %arg8: memref<1x128xf32, #tpu.memory_space<vmem>>, %arg9: memref<1x128xf32, #tpu.memory_space<vmem>>, %arg10: memref<8x128xf32, #tpu.memory_space<vmem>>) attributes {dimension_semantics = [#tpu.dimension_semantics<parallel>], iteration_bounds = array<i64: 1>, scalar_prefetch = 0 : i64, scratch_operands = 0 : i64, tpu.core_type = #tpu.core_type<tc>, window_params = [{transform_indices = @transform_0, window_bounds = array<i64: 8, 16>}, {pipeline_mode = #tpu.pipeline_mode<synchronous>, transform_indices = @transform_1, window_bounds = array<i64: 16, 128>}, {pipeline_mode = #tpu.pipeline_mode<synchronous>, transform_indices = @transform_2, window_bounds = array<i64: 1, 128>}, {pipeline_mode = #tpu.pipeline_mode<synchronous>, transform_indices = @transform_3, window_bounds = array<i64: 128, 128>}, {pipeline_mode = #tpu.pipeline_mode<synchronous>, transform_indices = @transform_4, window_bounds = array<i64: 1, 128>}, {pipeline_mode = #tpu.pipeline_mode<synchronous>, transform_indices = @transform_5, window_bounds = array<i64: 128, 128>}, {pipeline_mode = #tpu.pipeline_mode<synchronous>, transform_indices = @transform_6, window_bounds = array<i64: 1, 128>}, {pipeline_mode = #tpu.pipeline_mode<synchronous>, transform_indices = @transform_7, window_bounds = array<i64: 1, 128>}, {pipeline_mode = #tpu.pipeline_mode<synchronous>, transform_indices = @transform_8, window_bounds = array<i64: 1, 128>}, {transform_indices = @transform_9, window_bounds = array<i64: 8, 128>}]} {
    %c0 = arith.constant 0 : index
    %c0_0 = arith.constant 0 : index
    %0 = vector.load %arg1[%c0, %c0_0] : memref<8x16xf32, #tpu.memory_space<vmem>>, vector<8x16xf32>
    %c0_1 = arith.constant 0 : index
    %c0_2 = arith.constant 0 : index
    %1 = vector.load %arg2[%c0_1, %c0_2] : memref<16x128xf32, #tpu.memory_space<vmem>>, vector<16x128xf32>
    %cst = arith.constant dense<0.000000e+00> : vector<8x128xf32>
    %2 = tpu.matmul %0, %1, %cst {dimension_numbers = #tpu.dot_dimension_numbers<[1], [0], [0], [1], [0, 0, 1, 1], [], []>} : vector<8x16xf32>, vector<16x128xf32>, vector<8x128xf32> -> vector<8x128xf32>
    %c0_3 = arith.constant 0 : index
    %c0_4 = arith.constant 0 : index
    %3 = vector.load %arg3[%c0_3, %c0_4] : memref<1x128xf32, #tpu.memory_space<vmem>>, vector<1x128xf32>
    %4 = vector.broadcast %3 : vector<1x128xf32> to vector<8x128xf32>
    %5 = arith.addf %2, %4 : vector<8x128xf32>
    %cst_5 = arith.constant 0.000000e+00 : f32
    %6 = vector.broadcast %cst_5 : f32 to vector<8x128xf32>
    %7 = arith.maximumf %5, %6 : vector<8x128xf32>
    %c0_6 = arith.constant 0 : index
    %c0_7 = arith.constant 0 : index
    %8 = vector.load %arg4[%c0_6, %c0_7] : memref<128x128xf32, #tpu.memory_space<vmem>>, vector<128x128xf32>
    %cst_8 = arith.constant dense<0.000000e+00> : vector<8x128xf32>
    %9 = tpu.matmul %7, %8, %cst_8 {dimension_numbers = #tpu.dot_dimension_numbers<[1], [0], [0], [1], [0, 0, 1, 1], [], []>} : vector<8x128xf32>, vector<128x128xf32>, vector<8x128xf32> -> vector<8x128xf32>
    %c0_9 = arith.constant 0 : index
    %c0_10 = arith.constant 0 : index
    %10 = vector.load %arg5[%c0_9, %c0_10] : memref<1x128xf32, #tpu.memory_space<vmem>>, vector<1x128xf32>
    %11 = vector.broadcast %10 : vector<1x128xf32> to vector<8x128xf32>
    %12 = arith.addf %9, %11 : vector<8x128xf32>
    %cst_11 = arith.constant 0.000000e+00 : f32
    %13 = vector.broadcast %cst_11 : f32 to vector<8x128xf32>
    %14 = arith.maximumf %12, %13 : vector<8x128xf32>
    %c0_12 = arith.constant 0 : index
    %c0_13 = arith.constant 0 : index
    %15 = vector.load %arg6[%c0_12, %c0_13] : memref<128x128xf32, #tpu.memory_space<vmem>>, vector<128x128xf32>
    %cst_14 = arith.constant dense<0.000000e+00> : vector<8x128xf32>
    %16 = tpu.matmul %14, %15, %cst_14 {dimension_numbers = #tpu.dot_dimension_numbers<[1], [0], [0], [1], [0, 0, 1, 1], [], []>} : vector<8x128xf32>, vector<128x128xf32>, vector<8x128xf32> -> vector<8x128xf32>
    %c0_15 = arith.constant 0 : index
    %c0_16 = arith.constant 0 : index
    %17 = vector.load %arg7[%c0_15, %c0_16] : memref<1x128xf32, #tpu.memory_space<vmem>>, vector<1x128xf32>
    %18 = vector.broadcast %17 : vector<1x128xf32> to vector<8x128xf32>
    %19 = arith.addf %16, %18 : vector<8x128xf32>
    %c0_17 = arith.constant 0 : index
    %c0_18 = arith.constant 0 : index
    %20 = vector.load %arg8[%c0_17, %c0_18] : memref<1x128xf32, #tpu.memory_space<vmem>>, vector<1x128xf32>
    %21 = vector.broadcast %20 : vector<1x128xf32> to vector<8x128xf32>
    %22 = arith.maximumf %19, %21 : vector<8x128xf32>
    %c0_19 = arith.constant 0 : index
    %c0_20 = arith.constant 0 : index
    %23 = vector.load %arg9[%c0_19, %c0_20] : memref<1x128xf32, #tpu.memory_space<vmem>>, vector<1x128xf32>
    %24 = vector.broadcast %23 : vector<1x128xf32> to vector<8x128xf32>
    %25 = arith.minimumf %22, %24 : vector<8x128xf32>
    %c0_21 = arith.constant 0 : index
    %c0_22 = arith.constant 0 : index
    %26 = vector.load %arg10[%c0_21, %c0_22] : memref<8x128xf32, #tpu.memory_space<vmem>>, vector<8x128xf32>
    tpu.vector_store %arg10[%c0_21, %c0_22], %25 {strides = array<i32>} : memref<8x128xf32, #tpu.memory_space<vmem>>, vector<8x128xf32>,
    return
  }
  func.func @transform_0(%arg0: i32) -> (i32, i32) {
    %c0_i32 = arith.constant 0 : i32
    %c0_i32_0 = arith.constant 0 : i32
    return %arg0, %c0_i32 : i32, i32
  }
  func.func @transform_1(%arg0: i32) -> (i32, i32) {
    %c0_i32 = arith.constant 0 : i32
    %c0_i32_0 = arith.constant 0 : i32
    %c0_i32_1 = arith.constant 0 : i32
    return %c0_i32, %c0_i32_0 : i32, i32
  }
  func.func @transform_2(%arg0: i32) -> (i32, i32) {
    %c0_i32 = arith.constant 0 : i32
    %c0_i32_0 = arith.constant 0 : i32
    %c0_i32_1 = arith.constant 0 : i32
    return %c0_i32, %c0_i32_0 : i32, i32
  }
  func.func @transform_3(%arg0: i32) -> (i32, i32) {
    %c0_i32 = arith.constant 0 : i32
    %c0_i32_0 = arith.constant 0 : i32
    %c0_i32_1 = arith.constant 0 : i32
    return %c0_i32, %c0_i32_0 : i32, i32
  }
  func.func @transform_4(%arg0: i32) -> (i32, i32) {
    %c0_i32 = arith.constant 0 : i32
    %c0_i32_0 = arith.constant 0 : i32
    %c0_i32_1 = arith.constant 0 : i32
    return %c0_i32, %c0_i32_0 : i32, i32
  }
  func.func @transform_5(%arg0: i32) -> (i32, i32) {
    %c0_i32 = arith.constant 0 : i32
    %c0_i32_0 = arith.constant 0 : i32
    %c0_i32_1 = arith.constant 0 : i32
    return %c0_i32, %c0_i32_0 : i32, i32
  }
  func.func @transform_6(%arg0: i32) -> (i32, i32) {
    %c0_i32 = arith.constant 0 : i32
    %c0_i32_0 = arith.constant 0 : i32
    %c0_i32_1 = arith.constant 0 : i32
    return %c0_i32, %c0_i32_0 : i32, i32
  }
  func.func @transform_7(%arg0: i32) -> (i32, i32) {
    %c0_i32 = arith.constant 0 : i32
    %c0_i32_0 = arith.constant 0 : i32
    %c0_i32_1 = arith.constant 0 : i32
    return %c0_i32, %c0_i32_0 : i32, i32
  }
  func.func @transform_8(%arg0: i32) -> (i32, i32) {
    %c0_i32 = arith.constant 0 : i32
    %c0_i32_0 = arith.constant 0 : i32
    %c0_i32_1 = arith.constant 0 : i32
    return %c0_i32, %c0_i32_0 : i32, i32
  }
  func.func @transform_9(%arg0: i32) -> (i32, i32) {
    %c0_i32 = arith.constant 0 : i32
    %c0_i32_0 = arith.constant 0 : i32
    return %arg0, %c0_i32 : i32, i32
  }
}

</mosaic_0001>

<bundles_post_ra>
// kernel: squashed_gaussian_policy_forward.1
= control target key start
LH: loop header
LB: loop body
LE: loop exit
PB: predicated region body
PF: predicated region fallthrough
CT: control target
= control target key end

     0   :  { %14 = vsyncpa [#allocation3], 0  ;;  %s759_s0 = inlined_call_operand.hbm [shape: f32[8,16], index: 0, kind: input, shape index: {}]   ;;  %s760_s1 = inlined_call_operand.vmem [shape: f32[16,128], index: 1, kind: input, shape index: {}]   ;;  %s761_s2 = inlined_call_operand.vmem [shape: f32[1,128], index: 2, kind: input, shape index: {}]   ;;  %s762_s3 = inlined_call_operand.hbm [shape: f32[128,128], index: 3, kind: input, shape index: {}]   ;;  %s763_s4 = inlined_call_operand.vmem [shape: f32[1,128], index: 4, kind: input, shape index: {}]   ;;  %s764_s5 = inlined_call_operand.hbm [shape: f32[128,128], index: 5, kind: input, shape index: {}]   ;;  %s765_s6 = inlined_call_operand.vmem [shape: f32[1,128], index: 6, kind: input, shape index: {}]   ;;  %s766_s7 = inlined_call_operand.vmem [shape: f32[1,128], index: 7, kind: input, shape index: {}]   ;;  %s767_s8 = inlined_call_operand.vmem [shape: f32[1,128], index: 8, kind: input, shape index: {}]   ;;  %s768_s9 = inlined_call_operand.vmem [shape: f32[8,128], index: 9, kind: output, shape index: {}]  }
   0x1   :  { %15 = vsyncpa [#allocation5], 0  ;;  %s615_s30 = smov [#allocation4]   ;;  %s545_s13 = scalar_lea.hbm %s762_s3, 2048 }
   0x2   :  { %s35_s10 = sshll.u32 %s615_s30, 4  ;;  %p546_p0 = scmp.ne.s32.totalorder %s762_s3, %s545_s13  ;;  %s36_s10 = int_to_ptr.vmem [resolvable:$true] %s35_s10 }
   0x3   :  { %p549_p1 = scmp.lt.u32.totalorder %s545_s13, %s762_s3 }
   0x5   :  { %p551_p2 = pnand %p549_p1, %p546_p0 }
   0x7   :  { %554 = shalt.err (!%p551_p2)
}
   0x8   :  { %s555_s18 = scalar_lea.vmem %s36_s10, 2048  ;;  %p560_p4 = scmp.lt.s32.totalorder %s36_s10, %s36_s10 }
   0x9   :  { %p556_p3 = scmp.ne.s32.totalorder %s36_s10, %s555_s18  ;;  %p561_p5 = scmp.lt.s32.totalorder %s555_s18, %s555_s18 }
   0xb   :  { %p562_p6 = por %p561_p5, %p560_p4 }
   0xd   :  { %p563_p7 = pnand %p562_p6, %p556_p3 }
   0xf   :  { %566 = shalt.err (!%p563_p7)
}
  0x10   :  { %s616_s19 = smov 128   ;;  %s617_s20 = smov 8  }
  0x11   :  { %41 = dma.hbm_to_vmem [thread:$0]  %s762_s3, 2048, %s36_s10, [#allocation5], %s616_s19, %s616_s19, %s617_s20  }
  0x12   :  { %s618_s23 = smov [#allocation2]   ;;  %s619_s25 = smov [#allocation6]  }
  0x13   :  { %s22_s24 = sshll.u32 %s618_s23, 4  ;;  %s49_s26 = sshll.u32 %s619_s25, 4  ;;  %s23_s24 = int_to_ptr.vmem [resolvable:$true] %s22_s24  ;;  %s50_s26 = int_to_ptr.vmem [resolvable:$true] %s49_s26 }
  0x14   :  { %s567_s29 = scalar_lea.hbm %s759_s0, 128 }
  0x15   :  { %p568_p8 = scmp.ne.s32.totalorder %s759_s0, %s567_s29  ;;  %p571_p9 = scmp.lt.u32.totalorder %s567_s29, %s759_s0 }
  0x17   :  { %p573_p10 = pnand %p571_p9, %p568_p8 }
  0x19   :  { %576 = shalt.err (!%p573_p10)
}
  0x1a   :  { %s577_s3 = scalar_lea.vmem %s23_s24, 128  ;;  %p582_p12 = scmp.lt.s32.totalorder %s23_s24, %s23_s24 }
  0x1b   :  { %p578_p11 = scmp.ne.s32.totalorder %s23_s24, %s577_s3  ;;  %p583_p13 = scmp.lt.s32.totalorder %s577_s3, %s577_s3 }
  0x1d   :  { %p584_p0 = por %p583_p13, %p582_p12 }
  0x1f   :  { %p585_p1 = pnand %p584_p0, %p578_p11 }
  0x21   :  { %588 = shalt.err (!%p585_p1)
}
  0x22   :  { %25 = dma.hbm_to_vmem [thread:$0]  %s759_s0, 128, %s23_s24, [#allocation3]  }
  0x23   :  { %s589_s17 = scalar_lea.hbm %s764_s5, 2048 }
  0x24   :  { %p590_p2 = scmp.ne.s32.totalorder %s764_s5, %s589_s17  ;;  %p593_p3 = scmp.lt.u32.totalorder %s589_s17, %s764_s5 }
  0x26   :  { %p595_p4 = pnand %p593_p3, %p590_p2 }
  0x28   :  { %598 = shalt.err (!%p595_p4)
}
  0x29   :  { %s599_s25 = scalar_lea.vmem %s50_s26, 2048  ;;  %p604_p6 = scmp.lt.s32.totalorder %s50_s26, %s50_s26 }
  0x2a   :  { %p600_p5 = scmp.ne.s32.totalorder %s50_s26, %s599_s25  ;;  %p605_p7 = scmp.lt.s32.totalorder %s599_s25, %s599_s25 }
  0x2c   :  { %p606_p8 = por %p605_p7, %p604_p6 }
  0x2e   :  { %p607_p9 = pnand %p606_p8, %p600_p5 }
  0x30   :  { %610 = shalt.err (!%p607_p9)
}
  0x31   :  { %55 = dma.hbm_to_vmem [thread:$0]  %s764_s5, 2048, %s50_s26, [#allocation5], %s616_s19, %s616_s19, %s617_s20  }
  0x32   :  { %611 = dma.done.wait [#allocation3], 128  }
  0x33   :  { %612 = vsyncadd [#allocation3], 4294967168 }
  0x34   :  { %613 = dma.done.wait [#allocation5], 4096  }
  0x35   :  { %614 = vsyncadd [#allocation5], 4294963200  ;;  %v620_v0 = vmov 0.0|0.0   ;;  %vm621_vm0 = vmmov 0   ;;  %v622_v1 = vmov 0.0   ;;  %v72_v2 = vld [vmem:[%s760_s1] sm:$0xff] }
  0x36   :  { %486 = vmatprep.subr.bf16.mxu0 %v620_v0  ;;  %413 = vmatprep.mubr.msk.f32.mxu0 %vm621_vm0, %v622_v1  ;;  %v73_v3 = vld [vmem:[%s760_s1 + $0x8] sm:$0xff]  ;;  %v156_v5 = vld [vmem:[#allocation4] sm:$0xff]  ;;  %v157_v6 = vld [vmem:[#allocation4 + $0x8] sm:$0xff]  ;;  %vm81_vm1 = vcmask 130048  }
  0x37   :  { %489 = vmatprep.subr.bf16.mxu1 %v620_v0  ;;  %448 = vmatprep.mubr.msk.f32.mxu1 %vm621_vm0, %v622_v1  ;;  %v487_v4 = vpack.c.bf16 %v73_v3, %v72_v2  ;;  %v158_v7 = vld [vmem:[#allocation4 + $0x10] sm:$0xff]  ;;  %v490_v8 = vpack.c.bf16 %v157_v6, %v156_v5  ;;  %v159_v9 = vld [vmem:[#allocation4 + $0x18] sm:$0xff]  ;;  %v160_v12 = vld [vmem:[#allocation4 + $0x20] sm:$0xff] }
  0x38   :  { %v71_v10 = vld [vmem:[#allocation2] sm:$0xff]  ;;  %v493_v11 = vpack.c.bf16 %v159_v9, %v158_v7  ;;  %v161_v13 = vld [vmem:[#allocation4 + $0x28] sm:$0xff]  ;;  %v162_v15 = vld [vmem:[#allocation4 + $0x30] sm:$0xff] }
  0x39   :  { %488 = vmatpush3.bf16.msra.mxu0 %v487_v4  ;;  %491 = vmatpush3.bf16.msra.mxu1 %v490_v8  ;;  %v496_v14 = vpack.c.bf16 %v161_v13, %v160_v12  ;;  %v163_v16 = vld [vmem:[#allocation4 + $0x38] sm:$0xff]  ;;  %v164_v18 = vld [vmem:[#allocation4 + $0x40] sm:$0xff]  ;;  %v165_v19 = vld [vmem:[#allocation4 + $0x48] sm:$0xff] }
  0x3a   :  { %513 = vmatprep.subr.bf16.mxu0 %v620_v0  ;;  %492 = vmatprep.subr.bf16.mxu1 %v620_v0  ;;  %v499_v17 = vpack.c.bf16 %v163_v16, %v162_v15  ;;  %v502_v20 = vpack.c.bf16 %v165_v19, %v164_v18  ;;  %v166_v21 = vld [vmem:[#allocation4 + $0x50] sm:$0xff]  ;;  %v167_v22 = vld [vmem:[#allocation4 + $0x58] sm:$0xff]  ;;  %v168_v24 = vld [vmem:[#allocation4 + $0x60] sm:$0xff] }
  0x3b   :  { %v505_v23 = vpack.c.bf16 %v167_v22, %v166_v21  ;;  %v169_v25 = vld [vmem:[#allocation4 + $0x68] sm:$0xff]  ;;  %v170_v27 = vld [vmem:[#allocation4 + $0x70] sm:$0xff]  ;;  %v171_v28 = vld [vmem:[#allocation4 + $0x78] sm:$0xff] }
  0x3c   :  { %414 = vmatmul.mubr.msk.f32.vlgmr.msra.gmra.mrb[0].mxu0 %vm81_vm1, %v71_v10  ;;  %v508_v26 = vpack.c.bf16 %v169_v25, %v168_v24  ;;  %v511_v29 = vpack.c.bf16 %v171_v28, %v170_v27  ;;  %v250_v30 = vld [vmem:[#allocation6] sm:$0xff]  ;;  %v251_v31 = vld [vmem:[#allocation6 + $0x8] sm:$0xff]  ;;  %v252_v32 = vld [vmem:[#allocation6 + $0x10] sm:$0xff] }
  0x3d   :  { %483 = vmatprep.mubr.msk.f32.mxu0 %vm621_vm0, %v622_v1  ;;  %494 = vmatpush3.bf16.msra.mxu1 %v493_v11  ;;  %v514_v33 = vpack.c.bf16 %v251_v31, %v250_v30  ;;  %v253_v34 = vld [vmem:[#allocation6 + $0x18] sm:$0xff]  ;;  %v254_v36 = vld [vmem:[#allocation6 + $0x20] sm:$0xff]  ;;  %v255_v37 = vld [vmem:[#allocation6 + $0x28] sm:$0xff] }
  0x3e   :  { %495 = vmatprep.subr.bf16.mxu1 %v620_v0  ;;  %v517_v35 = vpack.c.bf16 %v253_v34, %v252_v32  ;;  %v520_v38 = vpack.c.bf16 %v255_v37, %v254_v36  ;;  %v256_v39 = vld [vmem:[#allocation6 + $0x30] sm:$0xff]  ;;  %v257_v40 = vld [vmem:[#allocation6 + $0x38] sm:$0xff]  ;;  %v258_v42 = vld [vmem:[#allocation6 + $0x40] sm:$0xff] }
  0x3f   :  { %515 = vmatpush3.bf16.msra.mxu0 %v514_v33  ;;  %v523_v41 = vpack.c.bf16 %v257_v40, %v256_v39  ;;  %v259_v43 = vld [vmem:[#allocation6 + $0x48] sm:$0xff]  ;;  %v260_v45 = vld [vmem:[#allocation6 + $0x50] sm:$0xff]  ;;  %v261_v46 = vld [vmem:[#allocation6 + $0x58] sm:$0xff] }
  0x40   :  { %516 = vmatprep.subr.bf16.mxu0 %v620_v0  ;;  %v526_v44 = vpack.c.bf16 %v259_v43, %v258_v42  ;;  %v529_v47 = vpack.c.bf16 %v261_v46, %v260_v45  ;;  %v262_v48 = vld [vmem:[#allocation6 + $0x60] sm:$0xff]  ;;  %v263_v49 = vld [vmem:[#allocation6 + $0x68] sm:$0xff]  ;;  %v264_v56 = vld [vmem:[#allocation6 + $0x70] sm:$0xff] }
  0x41   :  { %497 = vmatpush3.bf16.msra.mxu1 %v496_v14  ;;  %v532_v50 = vpack.c.bf16 %v263_v49, %v262_v48  ;;  %v366_v51 = vld [vmem:[%s761_s2] ss:$0 sm:$0xff]  ;;  %v265_v57 = vld [vmem:[#allocation6 + $0x78] sm:$0xff] }
  0x42   :  { %498 = vmatprep.subr.bf16.mxu1 %v620_v0  ;;  %v535_v58 = vpack.c.bf16 %v265_v57, %v264_v56  ;;  %v368_v59 = vld [vmem:[%s763_s4] ss:$0 sm:$0xff] }
  0x43   :  { %518 = vmatpush3.bf16.msra.mxu0 %v517_v35  ;;  %v370_v2 = vld [vmem:[%s766_s7] ss:$0 sm:$0xff] }
  0x44   :  { %519 = vmatprep.subr.bf16.mxu0 %v620_v0  ;;  %v371_v5 = vld [vmem:[%s767_s8] ss:$0 sm:$0xff] }
  0x45   :  { %500 = vmatpush3.bf16.msra.mxu1 %v499_v17 }
  0x46   :  { %501 = vmatprep.subr.bf16.mxu1 %v620_v0 }
  0x47   :  { %521 = vmatpush3.bf16.msra.mxu0 %v520_v38 }
  0x48   :  { %522 = vmatprep.subr.bf16.mxu0 %v620_v0 }
  0x49   :  { %503 = vmatpush3.bf16.msra.mxu1 %v502_v20 }
  0x4a   :  { %504 = vmatprep.subr.bf16.mxu1 %v620_v0 }
  0x4b   :  { %524 = vmatpush3.bf16.msra.mxu0 %v523_v41 }
  0x4c   :  { %525 = vmatprep.subr.bf16.mxu0 %v620_v0 }
  0x4d   :  { %506 = vmatpush3.bf16.msra.mxu1 %v505_v23 }
  0x4e   :  { %507 = vmatprep.subr.bf16.mxu1 %v620_v0 }
  0x4f   :  { %527 = vmatpush3.bf16.msra.mxu0 %v526_v44 }
  0x50   :  { %528 = vmatprep.subr.bf16.mxu0 %v620_v0 }
  0x51   :  { %509 = vmatpush3.bf16.msra.mxu1 %v508_v26 }
  0x52   :  { %510 = vmatprep.subr.bf16.mxu1 %v620_v0 }
  0x53   :  { %530 = vmatpush3.bf16.msra.mxu0 %v529_v47 }
  0x54   :  { %531 = vmatprep.subr.bf16.mxu0 %v620_v0 }
  0x55   :  { %512 = vmatpush3.bf16.msra.mxu1 %v511_v29 }
  0x57   :  { %533 = vmatpush3.bf16.msra.mxu0 %v532_v50 }
  0x58   :  { %534 = vmatprep.subr.bf16.mxu0 %v620_v0  ;;  %v369_v0 = vld [vmem:[%s765_s6] ss:$0 sm:$0xff] }
  0x5b   :  { %536 = vmatpush3.bf16.msra.mxu0 %v535_v58 }
 0x10f   :  { %v151_v52 = vpop.f32.mrb[0].mxu0 }
 0x110   :  { %v152_v53 = vadd.f32 %v366_v51, %v151_v52  ;;  %v415_v54 = vpop.f32.mrb[1].mxu0 }
 0x112   :  { %v155_v55 = vmax.f32 %v152_v53, 0.0 }
 0x114   :  { %449 = vmatmul.mubr.f32.vlgmr.msra.gmra.mrb[0].mxu1 %v155_v55 }
 0x1e7   :  { %v245_v60 = vpop.f32.mrb[0].mxu1 }
 0x1e8   :  { %v246_v61 = vadd.f32 %v368_v59, %v245_v60  ;;  %v450_v62 = vpop.f32.mrb[1].mxu1 }
 0x1ea   :  { %v249_v63 = vmax.f32 %v246_v61, 0.0 }
 0x1ec   :  { %484 = vmatmul.mubr.f32.vlgmr.msra.gmra.mrb[2].mxu0 %v249_v63 }
 0x2bf   :  { %v339_v1 = vpop.f32.mrb[2].mxu0 }
 0x2c0   :  { %v340_v3 = vadd.f32 %v369_v0, %v339_v1  ;;  %v485_v4 = vpop.f32.mrb[3].mxu0 }
 0x2c2   :  { %v350_v6 = vmax.f32 %v340_v3, %v370_v2 }
 0x2c4   :  { %v358_v7 = vmin.f32 %v350_v6, %v371_v5 }
 0x2c6   :  { %359 = vst [vmem:[%s768_s9] sm:$0xff] %v358_v7 }
 0x2c7   :  { %364 = vsyncpa [#allocation3], 1 }
 0x2c8   :  { %365 = vsyncpa [#allocation5], 1 }

</bundles_post_ra>
